<compile_context>
chip_gen: v7x
topology: tpu7x:2x2x1
jax: 0.10.0
libtpu: 0.0.40
codegen_flags: <defaults>
</compile_context>

<pallas_src>
import numpy as np
import jax
import jax.numpy as jnp
from jax.experimental import pallas as pl
from jax.experimental.pallas import tpu as pltpu  # noqa: F401  (kept for TPU backend)

N_NODES = 8
N_EDGES = 16
HIDDEN = 128          # stands in for 768 of the PyTorch module (kept lane-aligned, small)
NUM_HEADS = 4
REL_VOCAB = 825
PAT_VOCAB = 10
NEG_SLOPE = 0.01      # F.leaky_relu default negative_slope


def _graph_encoder_kernel(rel_ref, pat_ref, src_oh_ref, dst_oh_ref,
                          w_ref, fv_src_ref, fv_dst_ref, out_ref):
    h = rel_ref[...]              # [N, H]  node features (rel embeddings)
    p = pat_ref[...]              # [E, H]  edge features (pattern embeddings)
    src_oh = src_oh_ref[...]      # [E, N]  one-hot of src node per edge
    dst_oh = dst_oh_ref[...]      # [E, N]  one-hot of dst node per edge

    # ---- head-invariant work, computed once ----
    h_src = jnp.dot(src_oh, h, preferred_element_type=jnp.float32)   # [E, H]
    h_dst = jnp.dot(dst_oh, h, preferred_element_type=jnp.float32)   # [E, H]
    xp = h_src * p                                                    # [E, H]
    edge_mask = dst_oh > 0                                            # [E, N]

    # in-degree, lane-broadcast to [N, H] so the deg-0 fallback needs no transpose
    ones_eh = jnp.ones((N_EDGES, HIDDEN), jnp.float32)
    deg_b = jax.lax.dot_general(dst_oh, ones_eh,
                                dimension_numbers=(((0,), (0,)), ((), ())),
                                preferred_element_type=jnp.float32)   # [N, H]
    has_in = deg_b > 0                                                # [N, H]

    neg_inf = jnp.float32(-jnp.inf)
    acc = jnp.zeros((1, HIDDEN), jnp.float32)                         # per-head node-sums

    # ---- static unroll over heads (single kernel invocation, no grid) ----
    for hi in range(NUM_HEADS):
        fv_s = fv_src_ref[hi:hi + 1, :]      # [1, H]  = a_src @ W  (folded attention)
        fv_d = fv_dst_ref[hi:hi + 1, :]      # [1, H]  = a_dst @ W
        w = w_ref[hi]                        # [H, H]  fc weight, pre-transposed (y = x @ w)

        # attention logit: z1 @ a_src^T + zd @ a_dst^T, with both projections folded
        logits = (jnp.sum(xp * fv_s, axis=-1, keepdims=True)
                  + jnp.sum(h_dst * fv_d, axis=-1, keepdims=True))    # [E, 1]
        e = jnp.where(logits >= 0, logits, NEG_SLOPE * logits)        # leaky_relu

        # per-destination-node softmax over incoming edges (edge axis = sublane axis)
        scores = jnp.where(edge_mask, e, neg_inf)                     # [E, N]
        m = jnp.max(scores, axis=0, keepdims=True)                    # [1, N]
        m = jnp.where(jnp.isfinite(m), m, 0.0)                        # guard deg-0 nodes
        pexp = jnp.where(edge_mask, jnp.exp(scores - m), 0.0)         # [E, N]
        denom = jnp.sum(pexp, axis=0, keepdims=True)                  # [1, N]
        alpha = pexp / jnp.where(denom > 0, denom, 1.0)               # [E, N]

        # aggregate BEFORE the fc projection (fc is linear, so this is exact):
        #   agg = alpha^T @ (h_src * p)   -> [N, H]
        agg = jax.lax.dot_general(alpha, xp,
                                  dimension_numbers=(((0,), (0,)), ((), ())),
                                  preferred_element_type=jnp.float32)  # [N, H]
        h_out = jnp.dot(agg, w, preferred_element_type=jnp.float32)    # [N, H]

        # DGL UDF reduce leaves nodes with no incoming edges untouched (keep old 'h')
        h_out = jnp.where(has_in, h_out, h)

        acc = acc + jnp.sum(h_out, axis=0, keepdims=True)              # [1, H]

    # MultiHeadGATLayer: torch.mean(torch.stack(head_outs)) -> scalar mean, then ReLU
    h_sum = jnp.sum(acc, axis=-1, keepdims=True)                       # [1, 1]
    h1 = h_sum / (NUM_HEADS * N_NODES * HIDDEN)
    h1 = jnp.maximum(h1, 0.0)
    # e_h = dgl.sum_nodes(rel_h + h1) = sum_v rel_h[v] + N * h1
    out_ref[...] = jnp.sum(h, axis=0, keepdims=True) + N_NODES * h1


def graph_encoder_pallas(rel_h, pat_h, src_oh, dst_oh, w_t, fv_src, fv_dst):
    # Single invocation, no grid: every operand fits comfortably in VMEM
    # (weights are 4*128*128*4 B = 256 KiB), so all blocks are whole arrays.
    return pl.pallas_call(
        _graph_encoder_kernel,
        out_shape=jax.ShapeDtypeStruct((1, HIDDEN), jnp.float32),
    )(rel_h, pat_h, src_oh, dst_oh, w_t, fv_src, fv_dst)


def graph_encoder_ref(rel_h, pat_h, src, dst, W, attn_w):
    """Independent pure-numpy reference mirroring the PyTorch/DGL semantics."""
    rel_h = np.asarray(rel_h)
    pat_h = np.asarray(pat_h)
    src = np.asarray(src)
    dst = np.asarray(dst)
    W = np.asarray(W)
    attn_w = np.asarray(attn_w)

    head_outs = []
    for hi in range(NUM_HEADS):
        w = W[hi]                                    # [out, in]
        z1 = (rel_h[src] * pat_h) @ w.T              # [E, H]
        zd = rel_h[dst] @ w.T                        # [E, H]
        z2 = np.concatenate([z1, zd], axis=1)        # [E, 2H]
        a = z2 @ attn_w[hi][:, None]                 # [E, 1]
        e = np.where(a >= 0, a, NEG_SLOPE * a)[:, 0]
        out = np.zeros_like(rel_h)
        for v in range(N_NODES):
            idx = np.where(dst == v)[0]
            if len(idx) == 0:
                out[v] = rel_h[v]                    # DGL keeps old ndata
                continue
            ev = e[idx]
            ev = ev - ev.max()
            alpha = np.exp(ev) / np.exp(ev).sum()
            out[v] = (alpha[:, None] * z1[idx]).sum(0)
        head_outs.append(out)
    h1 = np.mean(np.stack(head_outs))                # scalar
    h1 = max(h1, 0.0)                                # ReLU
    e_h = (rel_h + h1).sum(0, keepdims=True)         # dgl.sum_nodes
    return jnp.asarray(e_h, dtype=jnp.float32)


if __name__ == "__main__":
    key = jax.random.PRNGKey(0)
    k_rel, k_pat, k_w, k_a, k_nidx, k_eidx = jax.random.split(key, 6)

    # NOTE: the PyTorch __init__ zeroes both embedding tables (constant_ 0.0), which
    # would make the whole forward trivially zero; we use deterministic random values
    # here so the kernel's compute path is actually exercised, but keep padding_idx=0
    # row of rel_embedding at zero.
    rel_emb = jax.random.normal(k_rel, (REL_VOCAB, HIDDEN), jnp.float32) * 0.1
    rel_emb = rel_emb.at[0].set(0.0)                 # padding_idx = 0
    pat_emb = jax.random.normal(k_pat, (PAT_VOCAB, HIDDEN), jnp.float32) * 0.1

    # per-head fc (bias=False) and attn_fc (bias=False) weights
    W = jax.random.normal(k_w, (NUM_HEADS, HIDDEN, HIDDEN), jnp.float32) / np.sqrt(HIDDEN)
    attn_w = jax.random.normal(k_a, (NUM_HEADS, 2 * HIDDEN), jnp.float32) / np.sqrt(2 * HIDDEN)

    # small deterministic graph: every node has >= 1 incoming edge
    node_idx = jax.random.randint(k_nidx, (N_NODES,), 1, REL_VOCAB)
    edge_idx = jax.random.randint(k_eidx, (N_EDGES,), 0, PAT_VOCAB)
    src = (jnp.arange(N_EDGES) * 3 + 1) % N_NODES
    dst = jnp.arange(N_EDGES) % N_NODES

    # glue (embedding lookups + structure matrices) in plain JAX
    rel_h = rel_emb[node_idx]                                    # [N, H]
    pat_h = pat_emb[edge_idx]                                    # [E, H]
    src_oh = jax.nn.one_hot(src, N_NODES, dtype=jnp.float32)     # [E, N]
    dst_oh = jax.nn.one_hot(dst, N_NODES, dtype=jnp.float32)     # [E, N]

    # pre-transpose fc weights so y = x @ w inside the kernel
    w_t = jnp.transpose(W, (0, 2, 1))                            # [heads, H_in, H_out]
    # fold attn_fc halves with the fc weight (exact):  logit = x . (a @ W)
    fv_src = jnp.einsum('ho,hoi->hi', attn_w[:, :HIDDEN], W)     # [heads, H]
    fv_dst = jnp.einsum('ho,hoi->hi', attn_w[:, HIDDEN:], W)     # [heads, H]

    out = graph_encoder_pallas(rel_h, pat_h, src_oh, dst_oh, w_t, fv_src, fv_dst)
    out = jax.block_until_ready(out)

    ref = graph_encoder_ref(rel_h, pat_h, src, dst, W, attn_w)
    if not np.allclose(np.asarray(out), np.asarray(ref), rtol=1e-4, atol=1e-4):
        raise AssertionError(f"mismatch: kernel={np.asarray(out)} ref={np.asarray(ref)}")

    print("KERNEL_OK")
</pallas_src>

<mosaic_0001>
module attributes {stable_mosaic.version = 11 : i64} {
  func.func @_graph_encoder_kernel(%arg0: memref<8x128xf32, #tpu.memory_space<vmem>>, %arg1: memref<16x128xf32, #tpu.memory_space<vmem>>, %arg2: memref<16x8xf32, #tpu.memory_space<vmem>>, %arg3: memref<16x8xf32, #tpu.memory_space<vmem>>, %arg4: memref<4x128x128xf32, #tpu.memory_space<vmem>>, %arg5: memref<4x128xf32, #tpu.memory_space<vmem>>, %arg6: memref<4x128xf32, #tpu.memory_space<vmem>>, %arg7: memref<1x128xf32, #tpu.memory_space<vmem>>) attributes {dimension_semantics = [], scalar_prefetch = 0 : i64, scratch_operands = 0 : i64, tpu.core_type = #tpu.core_type<tc>} {
    %c0 = arith.constant 0 : index
    %c0_0 = arith.constant 0 : index
    %0 = vector.load %arg0[%c0, %c0_0] : memref<8x128xf32, #tpu.memory_space<vmem>>, vector<8x128xf32>
    %c0_1 = arith.constant 0 : index
    %c0_2 = arith.constant 0 : index
    %1 = vector.load %arg1[%c0_1, %c0_2] : memref<16x128xf32, #tpu.memory_space<vmem>>, vector<16x128xf32>
    %c0_3 = arith.constant 0 : index
    %c0_4 = arith.constant 0 : index
    %2 = vector.load %arg2[%c0_3, %c0_4] : memref<16x8xf32, #tpu.memory_space<vmem>>, vector<16x8xf32>
    %c0_5 = arith.constant 0 : index
    %c0_6 = arith.constant 0 : index
    %3 = vector.load %arg3[%c0_5, %c0_6] : memref<16x8xf32, #tpu.memory_space<vmem>>, vector<16x8xf32>
    %cst = arith.constant dense<0.000000e+00> : vector<16x128xf32>
    %4 = tpu.matmul %2, %0, %cst {dimension_numbers = #tpu.dot_dimension_numbers<[1], [0], [0], [1], [0, 0, 1, 1], [], []>} : vector<16x8xf32>, vector<8x128xf32>, vector<16x128xf32> -> vector<16x128xf32>
    %cst_7 = arith.constant dense<0.000000e+00> : vector<16x128xf32>
    %5 = tpu.matmul %3, %0, %cst_7 {dimension_numbers = #tpu.dot_dimension_numbers<[1], [0], [0], [1], [0, 0, 1, 1], [], []>} : vector<16x8xf32>, vector<8x128xf32>, vector<16x128xf32> -> vector<16x128xf32>
    %6 = arith.mulf %4, %1 : vector<16x128xf32>
    %cst_8 = arith.constant 0.000000e+00 : f32
    %7 = vector.broadcast %cst_8 : f32 to vector<16x8xf32>
    %8 = arith.cmpf ogt, %3, %7 : vector<16x8xf32>
    %cst_9 = arith.constant 1.000000e+00 : f32
    %9 = vector.broadcast %cst_9 : f32 to vector<16x128xf32>
    %cst_10 = arith.constant dense<0.000000e+00> : vector<8x128xf32>
    %10 = tpu.matmul %3, %9, %cst_10 {dimension_numbers = #tpu.dot_dimension_numbers<[0], [0], [1], [1], [0, 1, 1, 1], [], []>} : vector<16x8xf32>, vector<16x128xf32>, vector<8x128xf32> -> vector<8x128xf32>
    %cst_11 = arith.constant 0.000000e+00 : f32
    %11 = vector.broadcast %cst_11 : f32 to vector<8x128xf32>
    %12 = arith.cmpf ogt, %10, %11 : vector<8x128xf32>
    %cst_12 = arith.constant 0.000000e+00 : f32
    %13 = vector.broadcast %cst_12 : f32 to vector<1x128xf32>
    %c0_13 = arith.constant 0 : index
    %c0_14 = arith.constant 0 : index
    %14 = vector.load %arg5[%c0_13, %c0_14] : memref<4x128xf32, #tpu.memory_space<vmem>>, vector<1x128xf32>
    %c0_15 = arith.constant 0 : index
    %c0_16 = arith.constant 0 : index
    %15 = vector.load %arg6[%c0_15, %c0_16] : memref<4x128xf32, #tpu.memory_space<vmem>>, vector<1x128xf32>
    %c0_17 = arith.constant 0 : index
    %c0_18 = arith.constant 0 : index
    %c0_19 = arith.constant 0 : index
    %16 = vector.load %arg4[%c0_17, %c0_18, %c0_19] : memref<4x128x128xf32, #tpu.memory_space<vmem>>, vector<1x128x128xf32>
    %17 = vector.shape_cast %16 : vector<1x128x128xf32> to vector<128x128xf32>
    %18 = vector.broadcast %14 : vector<1x128xf32> to vector<16x128xf32>
    %19 = arith.mulf %6, %18 : vector<16x128xf32>
    %cst_20 = arith.constant dense<0.000000e+00> : vector<16xf32>
    %20 = vector.multi_reduction <add>, %19, %cst_20 [1] : vector<16x128xf32> to vector<16xf32>
    %21 = vector.shape_cast %20 : vector<16xf32> to vector<16x1xf32>
    %22 = vector.broadcast %15 : vector<1x128xf32> to vector<16x128xf32>
    %23 = arith.mulf %5, %22 : vector<16x128xf32>
    %cst_21 = arith.constant dense<0.000000e+00> : vector<16xf32>
    %24 = vector.multi_reduction <add>, %23, %cst_21 [1] : vector<16x128xf32> to vector<16xf32>
    %25 = vector.shape_cast %24 : vector<16xf32> to vector<16x1xf32>
    %26 = arith.addf %21, %25 : vector<16x1xf32>
    %cst_22 = arith.constant 0.000000e+00 : f32
    %27 = vector.broadcast %cst_22 : f32 to vector<16x1xf32>
    %28 = arith.cmpf oge, %26, %27 : vector<16x1xf32>
    %cst_23 = arith.constant 0.00999999977 : f32
    %29 = vector.broadcast %cst_23 : f32 to vector<16x1xf32>
    %30 = arith.mulf %29, %26 : vector<16x1xf32>
    %31 = arith.select %28, %26, %30 : vector<16x1xi1>, vector<16x1xf32>
    %cst_24 = arith.constant 0xFF800000 : f32
    %32 = vector.shape_cast %31 : vector<16x1xf32> to vector<16x1xf32>
    %33 = vector.broadcast %32 : vector<16x1xf32> to vector<16x8xf32>
    %34 = vector.broadcast %cst_24 : f32 to vector<16x8xf32>
    %35 = arith.select %8, %33, %34 : vector<16x8xi1>, vector<16x8xf32>
    %cst_25 = arith.constant dense<0xFF800000> : vector<8xf32>
    %36 = vector.multi_reduction <maximumf>, %35, %cst_25 [0] : vector<16x8xf32> to vector<8xf32>
    %37 = vector.shape_cast %36 : vector<8xf32> to vector<1x8xf32>
    %38 = tpu.weird %37 : vector<1x8xf32> -> vector<1x8xi1>
    %cst_26 = arith.constant dense<true> : vector<1x8xi1>
    %39 = arith.xori %38, %cst_26 : vector<1x8xi1>
    %cst_27 = arith.constant 0.000000e+00 : f32
    %40 = vector.broadcast %cst_27 : f32 to vector<1x8xf32>
    %41 = arith.select %39, %37, %40 : vector<1x8xi1>, vector<1x8xf32>
    %42 = vector.broadcast %41 : vector<1x8xf32> to vector<16x8xf32>
    %43 = arith.subf %35, %42 : vector<16x8xf32>
    %44 = math.exp %43 : vector<16x8xf32>
    %cst_28 = arith.constant 0.000000e+00 : f32
    %45 = vector.broadcast %cst_28 : f32 to vector<16x8xf32>
    %46 = arith.select %8, %44, %45 : vector<16x8xi1>, vector<16x8xf32>
    %cst_29 = arith.constant dense<0.000000e+00> : vector<8xf32>
    %47 = vector.multi_reduction <add>, %46, %cst_29 [0] : vector<16x8xf32> to vector<8xf32>
    %48 = vector.shape_cast %47 : vector<8xf32> to vector<1x8xf32>
    %cst_30 = arith.constant 0.000000e+00 : f32
    %49 = vector.broadcast %cst_30 : f32 to vector<1x8xf32>
    %50 = arith.cmpf ogt, %48, %49 : vector<1x8xf32>
    %cst_31 = arith.constant 1.000000e+00 : f32
    %51 = vector.broadcast %cst_31 : f32 to vector<1x8xf32>
    %52 = arith.select %50, %48, %51 : vector<1x8xi1>, vector<1x8xf32>
    %53 = vector.broadcast %52 : vector<1x8xf32> to vector<16x8xf32>
    %54 = arith.divf %46, %53 : vector<16x8xf32>
    %cst_32 = arith.constant dense<0.000000e+00> : vector<8x128xf32>
    %55 = tpu.matmul %54, %6, %cst_32 {dimension_numbers = #tpu.dot_dimension_numbers<[0], [0], [1], [1], [0, 1, 1, 1], [], []>} : vector<16x8xf32>, vector<16x128xf32>, vector<8x128xf32> -> vector<8x128xf32>
    %cst_33 = arith.constant dense<0.000000e+00> : vector<8x128xf32>
    %56 = tpu.matmul %55, %17, %cst_33 {dimension_numbers = #tpu.dot_dimension_numbers<[1], [0], [0], [1], [0, 0, 1, 1], [], []>} : vector<8x128xf32>, vector<128x128xf32>, vector<8x128xf32> -> vector<8x128xf32>
    %57 = arith.select %12, %56, %0 : vector<8x128xi1>, vector<8x128xf32>
    %cst_34 = arith.constant dense<0.000000e+00> : vector<128xf32>
    %58 = vector.multi_reduction <add>, %57, %cst_34 [0] : vector<8x128xf32> to vector<128xf32>
    %59 = vector.shape_cast %58 : vector<128xf32> to vector<1x128xf32>
    %60 = arith.addf %13, %59 : vector<1x128xf32>
    %c1 = arith.constant 1 : index
    %c0_35 = arith.constant 0 : index
    %61 = vector.load %arg5[%c1, %c0_35] : memref<4x128xf32, #tpu.memory_space<vmem>>, vector<1x128xf32>
    %c1_36 = arith.constant 1 : index
    %c0_37 = arith.constant 0 : index
    %62 = vector.load %arg6[%c1_36, %c0_37] : memref<4x128xf32, #tpu.memory_space<vmem>>, vector<1x128xf32>
    %c1_38 = arith.constant 1 : index
    %c0_39 = arith.constant 0 : index
    %c0_40 = arith.constant 0 : index
    %63 = vector.load %arg4[%c1_38, %c0_39, %c0_40] : memref<4x128x128xf32, #tpu.memory_space<vmem>>, vector<1x128x128xf32>
    %64 = vector.shape_cast %63 : vector<1x128x128xf32> to vector<128x128xf32>
    %65 = vector.broadcast %61 : vector<1x128xf32> to vector<16x128xf32>
    %66 = arith.mulf %6, %65 : vector<16x128xf32>
    %cst_41 = arith.constant dense<0.000000e+00> : vector<16xf32>
    %67 = vector.multi_reduction <add>, %66, %cst_41 [1] : vector<16x128xf32> to vector<16xf32>
    %68 = vector.shape_cast %67 : vector<16xf32> to vector<16x1xf32>
    %69 = vector.broadcast %62 : vector<1x128xf32> to vector<16x128xf32>
    %70 = arith.mulf %5, %69 : vector<16x128xf32>
    %cst_42 = arith.constant dense<0.000000e+00> : vector<16xf32>
    %71 = vector.multi_reduction <add>, %70, %cst_42 [1] : vector<16x128xf32> to vector<16xf32>
    %72 = vector.shape_cast %71 : vector<16xf32> to vector<16x1xf32>
    %73 = arith.addf %68, %72 : vector<16x1xf32>
    %cst_43 = arith.constant 0.000000e+00 : f32
    %74 = vector.broadcast %cst_43 : f32 to vector<16x1xf32>
    %75 = arith.cmpf oge, %73, %74 : vector<16x1xf32>
    %cst_44 = arith.constant 0.00999999977 : f32
    %76 = vector.broadcast %cst_44 : f32 to vector<16x1xf32>
    %77 = arith.mulf %76, %73 : vector<16x1xf32>
    %78 = arith.select %75, %73, %77 : vector<16x1xi1>, vector<16x1xf32>
    %cst_45 = arith.constant 0xFF800000 : f32
    %79 = vector.shape_cast %78 : vector<16x1xf32> to vector<16x1xf32>
    %80 = vector.broadcast %79 : vector<16x1xf32> to vector<16x8xf32>
    %81 = vector.broadcast %cst_45 : f32 to vector<16x8xf32>
    %82 = arith.select %8, %80, %81 : vector<16x8xi1>, vector<16x8xf32>
    %cst_46 = arith.constant dense<0xFF800000> : vector<8xf32>
    %83 = vector.multi_reduction <maximumf>, %82, %cst_46 [0] : vector<16x8xf32> to vector<8xf32>
    %84 = vector.shape_cast %83 : vector<8xf32> to vector<1x8xf32>
    %85 = tpu.weird %84 : vector<1x8xf32> -> vector<1x8xi1>
    %cst_47 = arith.constant dense<true> : vector<1x8xi1>
    %86 = arith.xori %85, %cst_47 : vector<1x8xi1>
    %cst_48 = arith.constant 0.000000e+00 : f32
    %87 = vector.broadcast %cst_48 : f32 to vector<1x8xf32>
    %88 = arith.select %86, %84, %87 : vector<1x8xi1>, vector<1x8xf32>
    %89 = vector.broadcast %88 : vector<1x8xf32> to vector<16x8xf32>
    %90 = arith.subf %82, %89 : vector<16x8xf32>
    %91 = math.exp %90 : vector<16x8xf32>
    %cst_49 = arith.constant 0.000000e+00 : f32
    %92 = vector.broadcast %cst_49 : f32 to vector<16x8xf32>
    %93 = arith.select %8, %91, %92 : vector<16x8xi1>, vector<16x8xf32>
    %cst_50 = arith.constant dense<0.000000e+00> : vector<8xf32>
    %94 = vector.multi_reduction <add>, %93, %cst_50 [0] : vector<16x8xf32> to vector<8xf32>
    %95 = vector.shape_cast %94 : vector<8xf32> to vector<1x8xf32>
    %cst_51 = arith.constant 0.000000e+00 : f32
    %96 = vector.broadcast %cst_51 : f32 to vector<1x8xf32>
    %97 = arith.cmpf ogt, %95, %96 : vector<1x8xf32>
    %cst_52 = arith.constant 1.000000e+00 : f32
    %98 = vector.broadcast %cst_52 : f32 to vector<1x8xf32>
    %99 = arith.select %97, %95, %98 : vector<1x8xi1>, vector<1x8xf32>
    %100 = vector.broadcast %99 : vector<1x8xf32> to vector<16x8xf32>
    %101 = arith.divf %93, %100 : vector<16x8xf32>
    %cst_53 = arith.constant dense<0.000000e+00> : vector<8x128xf32>
    %102 = tpu.matmul %101, %6, %cst_53 {dimension_numbers = #tpu.dot_dimension_numbers<[0], [0], [1], [1], [0, 1, 1, 1], [], []>} : vector<16x8xf32>, vector<16x128xf32>, vector<8x128xf32> -> vector<8x128xf32>
    %cst_54 = arith.constant dense<0.000000e+00> : vector<8x128xf32>
    %103 = tpu.matmul %102, %64, %cst_54 {dimension_numbers = #tpu.dot_dimension_numbers<[1], [0], [0], [1], [0, 0, 1, 1], [], []>} : vector<8x128xf32>, vector<128x128xf32>, vector<8x128xf32> -> vector<8x128xf32>
    %104 = arith.select %12, %103, %0 : vector<8x128xi1>, vector<8x128xf32>
    %cst_55 = arith.constant dense<0.000000e+00> : vector<128xf32>
    %105 = vector.multi_reduction <add>, %104, %cst_55 [0] : vector<8x128xf32> to vector<128xf32>
    %106 = vector.shape_cast %105 : vector<128xf32> to vector<1x128xf32>
    %107 = arith.addf %60, %106 : vector<1x128xf32>
    %c2 = arith.constant 2 : index
    %c0_56 = arith.constant 0 : index
    %108 = vector.load %arg5[%c2, %c0_56] : memref<4x128xf32, #tpu.memory_space<vmem>>, vector<1x128xf32>
    %c2_57 = arith.constant 2 : index
    %c0_58 = arith.constant 0 : index
    %109 = vector.load %arg6[%c2_57, %c0_58] : memref<4x128xf32, #tpu.memory_space<vmem>>, vector<1x128xf32>
    %c2_59 = arith.constant 2 : index
    %c0_60 = arith.constant 0 : index
    %c0_61 = arith.constant 0 : index
    %110 = vector.load %arg4[%c2_59, %c0_60, %c0_61] : memref<4x128x128xf32, #tpu.memory_space<vmem>>, vector<1x128x128xf32>
    %111 = vector.shape_cast %110 : vector<1x128x128xf32> to vector<128x128xf32>
    %112 = vector.broadcast %108 : vector<1x128xf32> to vector<16x128xf32>
    %113 = arith.mulf %6, %112 : vector<16x128xf32>
    %cst_62 = arith.constant dense<0.000000e+00> : vector<16xf32>
    %114 = vector.multi_reduction <add>, %113, %cst_62 [1] : vector<16x128xf32> to vector<16xf32>
    %115 = vector.shape_cast %114 : vector<16xf32> to vector<16x1xf32>
    %116 = vector.broadcast %109 : vector<1x128xf32> to vector<16x128xf32>
    %117 = arith.mulf %5, %116 : vector<16x128xf32>
    %cst_63 = arith.constant dense<0.000000e+00> : vector<16xf32>
    %118 = vector.multi_reduction <add>, %117, %cst_63 [1] : vector<16x128xf32> to vector<16xf32>
    %119 = vector.shape_cast %118 : vector<16xf32> to vector<16x1xf32>
    %120 = arith.addf %115, %119 : vector<16x1xf32>
    %cst_64 = arith.constant 0.000000e+00 : f32
    %121 = vector.broadcast %cst_64 : f32 to vector<16x1xf32>
    %122 = arith.cmpf oge, %120, %121 : vector<16x1xf32>
    %cst_65 = arith.constant 0.00999999977 : f32
    %123 = vector.broadcast %cst_65 : f32 to vector<16x1xf32>
    %124 = arith.mulf %123, %120 : vector<16x1xf32>
    %125 = arith.select %122, %120, %124 : vector<16x1xi1>, vector<16x1xf32>
    %cst_66 = arith.constant 0xFF800000 : f32
    %126 = vector.shape_cast %125 : vector<16x1xf32> to vector<16x1xf32>
    %127 = vector.broadcast %126 : vector<16x1xf32> to vector<16x8xf32>
    %128 = vector.broadcast %cst_66 : f32 to vector<16x8xf32>
    %129 = arith.select %8, %127, %128 : vector<16x8xi1>, vector<16x8xf32>
    %cst_67 = arith.constant dense<0xFF800000> : vector<8xf32>
    %130 = vector.multi_reduction <maximumf>, %129, %cst_67 [0] : vector<16x8xf32> to vector<8xf32>
    %131 = vector.shape_cast %130 : vector<8xf32> to vector<1x8xf32>
    %132 = tpu.weird %131 : vector<1x8xf32> -> vector<1x8xi1>
    %cst_68 = arith.constant dense<true> : vector<1x8xi1>
    %133 = arith.xori %132, %cst_68 : vector<1x8xi1>
    %cst_69 = arith.constant 0.000000e+00 : f32
    %134 = vector.broadcast %cst_69 : f32 to vector<1x8xf32>
    %135 = arith.select %133, %131, %134 : vector<1x8xi1>, vector<1x8xf32>
    %136 = vector.broadcast %135 : vector<1x8xf32> to vector<16x8xf32>
    %137 = arith.subf %129, %136 : vector<16x8xf32>
    %138 = math.exp %137 : vector<16x8xf32>
    %cst_70 = arith.constant 0.000000e+00 : f32
    %139 = vector.broadcast %cst_70 : f32 to vector<16x8xf32>
    %140 = arith.select %8, %138, %139 : vector<16x8xi1>, vector<16x8xf32>
    %cst_71 = arith.constant dense<0.000000e+00> : vector<8xf32>
    %141 = vector.multi_reduction <add>, %140, %cst_71 [0] : vector<16x8xf32> to vector<8xf32>
    %142 = vector.shape_cast %141 : vector<8xf32> to vector<1x8xf32>
    %cst_72 = arith.constant 0.000000e+00 : f32
    %143 = vector.broadcast %cst_72 : f32 to vector<1x8xf32>
    %144 = arith.cmpf ogt, %142, %143 : vector<1x8xf32>
    %cst_73 = arith.constant 1.000000e+00 : f32
    %145 = vector.broadcast %cst_73 : f32 to vector<1x8xf32>
    %146 = arith.select %144, %142, %145 : vector<1x8xi1>, vector<1x8xf32>
    %147 = vector.broadcast %146 : vector<1x8xf32> to vector<16x8xf32>
    %148 = arith.divf %140, %147 : vector<16x8xf32>
    %cst_74 = arith.constant dense<0.000000e+00> : vector<8x128xf32>
    %149 = tpu.matmul %148, %6, %cst_74 {dimension_numbers = #tpu.dot_dimension_numbers<[0], [0], [1], [1], [0, 1, 1, 1], [], []>} : vector<16x8xf32>, vector<16x128xf32>, vector<8x128xf32> -> vector<8x128xf32>
    %cst_75 = arith.constant dense<0.000000e+00> : vector<8x128xf32>
    %150 = tpu.matmul %149, %111, %cst_75 {dimension_numbers = #tpu.dot_dimension_numbers<[1], [0], [0], [1], [0, 0, 1, 1], [], []>} : vector<8x128xf32>, vector<128x128xf32>, vector<8x128xf32> -> vector<8x128xf32>
    %151 = arith.select %12, %150, %0 : vector<8x128xi1>, vector<8x128xf32>
    %cst_76 = arith.constant dense<0.000000e+00> : vector<128xf32>
    %152 = vector.multi_reduction <add>, %151, %cst_76 [0] : vector<8x128xf32> to vector<128xf32>
    %153 = vector.shape_cast %152 : vector<128xf32> to vector<1x128xf32>
    %154 = arith.addf %107, %153 : vector<1x128xf32>
    %c3 = arith.constant 3 : index
    %c0_77 = arith.constant 0 : index
    %155 = vector.load %arg5[%c3, %c0_77] : memref<4x128xf32, #tpu.memory_space<vmem>>, vector<1x128xf32>
    %c3_78 = arith.constant 3 : index
    %c0_79 = arith.constant 0 : index
    %156 = vector.load %arg6[%c3_78, %c0_79] : memref<4x128xf32, #tpu.memory_space<vmem>>, vector<1x128xf32>
    %c3_80 = arith.constant 3 : index
    %c0_81 = arith.constant 0 : index
    %c0_82 = arith.constant 0 : index
    %157 = vector.load %arg4[%c3_80, %c0_81, %c0_82] : memref<4x128x128xf32, #tpu.memory_space<vmem>>, vector<1x128x128xf32>
    %158 = vector.shape_cast %157 : vector<1x128x128xf32> to vector<128x128xf32>
    %159 = vector.broadcast %155 : vector<1x128xf32> to vector<16x128xf32>
    %160 = arith.mulf %6, %159 : vector<16x128xf32>
    %cst_83 = arith.constant dense<0.000000e+00> : vector<16xf32>
    %161 = vector.multi_reduction <add>, %160, %cst_83 [1] : vector<16x128xf32> to vector<16xf32>
    %162 = vector.shape_cast %161 : vector<16xf32> to vector<16x1xf32>
    %163 = vector.broadcast %156 : vector<1x128xf32> to vector<16x128xf32>
    %164 = arith.mulf %5, %163 : vector<16x128xf32>
    %cst_84 = arith.constant dense<0.000000e+00> : vector<16xf32>
    %165 = vector.multi_reduction <add>, %164, %cst_84 [1] : vector<16x128xf32> to vector<16xf32>
    %166 = vector.shape_cast %165 : vector<16xf32> to vector<16x1xf32>
    %167 = arith.addf %162, %166 : vector<16x1xf32>
    %cst_85 = arith.constant 0.000000e+00 : f32
    %168 = vector.broadcast %cst_85 : f32 to vector<16x1xf32>
    %169 = arith.cmpf oge, %167, %168 : vector<16x1xf32>
    %cst_86 = arith.constant 0.00999999977 : f32
    %170 = vector.broadcast %cst_86 : f32 to vector<16x1xf32>
    %171 = arith.mulf %170, %167 : vector<16x1xf32>
    %172 = arith.select %169, %167, %171 : vector<16x1xi1>, vector<16x1xf32>
    %cst_87 = arith.constant 0xFF800000 : f32
    %173 = vector.shape_cast %172 : vector<16x1xf32> to vector<16x1xf32>
    %174 = vector.broadcast %173 : vector<16x1xf32> to vector<16x8xf32>
    %175 = vector.broadcast %cst_87 : f32 to vector<16x8xf32>
    %176 = arith.select %8, %174, %175 : vector<16x8xi1>, vector<16x8xf32>
    %cst_88 = arith.constant dense<0xFF800000> : vector<8xf32>
    %177 = vector.multi_reduction <maximumf>, %176, %cst_88 [0] : vector<16x8xf32> to vector<8xf32>
    %178 = vector.shape_cast %177 : vector<8xf32> to vector<1x8xf32>
    %179 = tpu.weird %178 : vector<1x8xf32> -> vector<1x8xi1>
    %cst_89 = arith.constant dense<true> : vector<1x8xi1>
    %180 = arith.xori %179, %cst_89 : vector<1x8xi1>
    %cst_90 = arith.constant 0.000000e+00 : f32
    %181 = vector.broadcast %cst_90 : f32 to vector<1x8xf32>
    %182 = arith.select %180, %178, %181 : vector<1x8xi1>, vector<1x8xf32>
    %183 = vector.broadcast %182 : vector<1x8xf32> to vector<16x8xf32>
    %184 = arith.subf %176, %183 : vector<16x8xf32>
    %185 = math.exp %184 : vector<16x8xf32>
    %cst_91 = arith.constant 0.000000e+00 : f32
    %186 = vector.broadcast %cst_91 : f32 to vector<16x8xf32>
    %187 = arith.select %8, %185, %186 : vector<16x8xi1>, vector<16x8xf32>
    %cst_92 = arith.constant dense<0.000000e+00> : vector<8xf32>
    %188 = vector.multi_reduction <add>, %187, %cst_92 [0] : vector<16x8xf32> to vector<8xf32>
    %189 = vector.shape_cast %188 : vector<8xf32> to vector<1x8xf32>
    %cst_93 = arith.constant 0.000000e+00 : f32
    %190 = vector.broadcast %cst_93 : f32 to vector<1x8xf32>
    %191 = arith.cmpf ogt, %189, %190 : vector<1x8xf32>
    %cst_94 = arith.constant 1.000000e+00 : f32
    %192 = vector.broadcast %cst_94 : f32 to vector<1x8xf32>
    %193 = arith.select %191, %189, %192 : vector<1x8xi1>, vector<1x8xf32>
    %194 = vector.broadcast %193 : vector<1x8xf32> to vector<16x8xf32>
    %195 = arith.divf %187, %194 : vector<16x8xf32>
    %cst_95 = arith.constant dense<0.000000e+00> : vector<8x128xf32>
    %196 = tpu.matmul %195, %6, %cst_95 {dimension_numbers = #tpu.dot_dimension_numbers<[0], [0], [1], [1], [0, 1, 1, 1], [], []>} : vector<16x8xf32>, vector<16x128xf32>, vector<8x128xf32> -> vector<8x128xf32>
    %cst_96 = arith.constant dense<0.000000e+00> : vector<8x128xf32>
    %197 = tpu.matmul %196, %158, %cst_96 {dimension_numbers = #tpu.dot_dimension_numbers<[1], [0], [0], [1], [0, 0, 1, 1], [], []>} : vector<8x128xf32>, vector<128x128xf32>, vector<8x128xf32> -> vector<8x128xf32>
    %198 = arith.select %12, %197, %0 : vector<8x128xi1>, vector<8x128xf32>
    %cst_97 = arith.constant dense<0.000000e+00> : vector<128xf32>
    %199 = vector.multi_reduction <add>, %198, %cst_97 [0] : vector<8x128xf32> to vector<128xf32>
    %200 = vector.shape_cast %199 : vector<128xf32> to vector<1x128xf32>
    %201 = arith.addf %154, %200 : vector<1x128xf32>
    %cst_98 = arith.constant dense<0.000000e+00> : vector<1xf32>
    %202 = vector.multi_reduction <add>, %201, %cst_98 [1] : vector<1x128xf32> to vector<1xf32>
    %203 = vector.shape_cast %202 : vector<1xf32> to vector<1x1xf32>
    %cst_99 = arith.constant 4.096000e+03 : f32
    %204 = vector.broadcast %cst_99 : f32 to vector<1x1xf32>
    %205 = arith.divf %203, %204 : vector<1x1xf32>
    %cst_100 = arith.constant 0.000000e+00 : f32
    %206 = vector.broadcast %cst_100 : f32 to vector<1x1xf32>
    %207 = arith.maximumf %205, %206 : vector<1x1xf32>
    %cst_101 = arith.constant dense<0.000000e+00> : vector<128xf32>
    %208 = vector.multi_reduction <add>, %0, %cst_101 [0] : vector<8x128xf32> to vector<128xf32>
    %209 = vector.shape_cast %208 : vector<128xf32> to vector<1x128xf32>
    %cst_102 = arith.constant 8.000000e+00 : f32
    %210 = vector.broadcast %cst_102 : f32 to vector<1x1xf32>
    %211 = arith.mulf %210, %207 : vector<1x1xf32>
    %212 = vector.broadcast %211 : vector<1x1xf32> to vector<1x128xf32>
    %213 = arith.addf %209, %212 : vector<1x128xf32>
    %c0_103 = arith.constant 0 : index
    %c0_104 = arith.constant 0 : index
    %214 = vector.load %arg7[%c0_103, %c0_104] : memref<1x128xf32, #tpu.memory_space<vmem>>, vector<1x128xf32>
    tpu.vector_store %arg7[%c0_103, %c0_104], %213 {strides = array<i32>} : memref<1x128xf32, #tpu.memory_space<vmem>>, vector<1x128xf32>,
    return
  }
}

</mosaic_0001>

<bundles_post_ra>
// kernel: tpu_custom_call.1
= control target key start
LH: loop header
LB: loop body
LE: loop exit
PB: predicated region body
PF: predicated region fallthrough
CT: control target
= control target key end

     0   :  { %12 = vsyncpa [#allocation3], 0  ;;  %s2204_s0 = inlined_call_operand.vmem [shape: f32[8,128], index: 0, kind: input, shape index: {}]   ;;  %s2205_s1 = inlined_call_operand.vmem [shape: f32[16,128], index: 1, kind: input, shape index: {}]   ;;  %s2206_s2 = inlined_call_operand.vmem [shape: f32[16,8], index: 2, kind: input, shape index: {}]   ;;  %s2207_s3 = inlined_call_operand.vmem [shape: f32[16,8], index: 3, kind: input, shape index: {}]   ;;  %s2208_s4 = inlined_call_operand.hbm [shape: f32[4,128,128], index: 4, kind: input, shape index: {}]   ;;  %s2209_s5 = inlined_call_operand.vmem [shape: f32[4,128], index: 5, kind: input, shape index: {}]   ;;  %s2210_s6 = inlined_call_operand.vmem [shape: f32[4,128], index: 6, kind: input, shape index: {}]   ;;  %s2211_s7 = inlined_call_operand.hbm [shape: f32[1,128], index: 7, kind: output, shape index: {}]  }
   0x1   :  { %13 = vsyncpa [#allocation4], 0  ;;  %s1897_s24 = smov [#allocation2]   ;;  %s1849_s28 = scalar_lea.hbm %s2208_s4, 8192 }
   0x2   :  { %s27_s25 = sshll.u32 %s1897_s24, 4  ;;  %p1850_p0 = scmp.ne.s32.totalorder %s2208_s4, %s1849_s28  ;;  %s28_s25 = int_to_ptr.vmem [resolvable:$true] %s27_s25 }
   0x3   :  { %p1853_p1 = scmp.lt.u32.totalorder %s1849_s28, %s2208_s4 }
   0x5   :  { %p1855_p2 = pnand %p1853_p1, %p1850_p0 }
   0x7   :  { %1858 = shalt.err (!%p1855_p2)
}
   0x8   :  { %s1859_s10 = scalar_lea.vmem %s28_s25, 8192  ;;  %p1864_p4 = scmp.lt.s32.totalorder %s28_s25, %s28_s25 }
   0x9   :  { %p1860_p3 = scmp.ne.s32.totalorder %s28_s25, %s1859_s10  ;;  %p1865_p5 = scmp.lt.s32.totalorder %s1859_s10, %s1859_s10 }
   0xb   :  { %p1866_p6 = por %p1865_p5, %p1864_p4 }
   0xd   :  { %p1867_p7 = pnand %p1866_p6, %p1860_p3 }
   0xf   :  { %1870 = shalt.err (!%p1867_p7)
}
  0x10   :  { %s1898_s11 = smov 128   ;;  %s1899_s12 = smov 8  }
  0x11   :  { %33 = dma.hbm_to_vmem [thread:$0]  %s2208_s4, 8192, %s28_s25, [#allocation3], %s1898_s11, %s1898_s11, %s1899_s12  }
  0x12   :  { %1893 = dma.done.wait [#allocation3], 8192  }
  0x13   :  { %1894 = vsyncadd [#allocation3], 4294959104  ;;  %vm48_vm0 = vcmask 64512   ;;  %v1961_v0 = vld [vmem:[%s2204_s0] sm:$0xff]  ;;  %v45_v3 = vld [vmem:[%s2206_s2 + $0x8] sm:$0xff]  ;;  %v1900_v5 = vmov 0.0|0.0  }
  0x14   :  { %v44_v1 = vld [vmem:[%s2206_s2] sm:$0xff]  ;;  %1520 = vmatprep.subr.mxu0 %v1961_v0  ;;  %1525 = vmatprep.subr.mxu1 %v1961_v0  ;;  %v1979_v4 = vld [vmem:[%s2207_s3 + $0x8] sm:$0xff]  ;;  %vm1901_vm5 = vmmov 0   ;;  %v1902_v47 = vmov 0.0   ;;  %vm1903_vm9 = vmmov 1   ;;  %vm247_vm15 = vcmask 130048  }
  0x15   :  { %v1969_v2 = vld [vmem:[%s2207_s3] sm:$0xff]  ;;  %1521 = vmatpush3.msra.mxu0 %v1961_v0  ;;  %1522 = vmatprep.mubr.msk.f32.mxu0 %vm48_vm0, %v44_v1  ;;  %v43_v6 = vld [vmem:[%s2205_s1 + $0x8] sm:$0xff]  ;;  %vm214_vm2 = vcmp.gt.f32.partialorder %v1979_v4, 0.0 }
  0x16   :  { %1526 = vmatpush3.msra.mxu1 %v1961_v0  ;;  %1527 = vmatprep.mubr.msk.f32.mxu1 %vm48_vm0, %v1969_v2  ;;  %v1420_v7 = vld [vmem:[%s2210_s6] ss:$0 sm:$0xff]  ;;  %v1422_v20 = vld [vmem:[%s2209_s5 + $0x1] ss:$0 sm:$0xff]  ;;  %vm213_vm3 = vcmp.gt.f32.partialorder %v1969_v2, 0.0 }
  0x17   :  { %1523 = vmatmul.mubr.msk.f32.vlgmr.msra.gmra.mrb[0].mxu0 %vm48_vm0, %v45_v3  ;;  %1528 = vmatmul.mubr.msk.f32.vlgmr.msra.gmra.mrb[0].mxu1 %vm48_vm0, %v1979_v4  ;;  %v42_v8 = vld [vmem:[%s2205_s1] sm:$0xff] }
  0x18   :  { %1707 = vmatprep.subr.bf16.mxu1 %v1900_v5  ;;  %1705 = vmatprep.subr.bf16.mxu0 %v1900_v5  ;;  %v1419_v11 = vld [vmem:[%s2209_s5] ss:$0 sm:$0xff]  ;;  %v1423_v23 = vld [vmem:[%s2210_s6 + $0x1] ss:$0 sm:$0xff] }
  0x19   :  { %1541 = vmatprep.mubr.msk.f32.mxu1 %vm1901_vm5, %v1902_v47  ;;  %1534 = vmatprep.mubr.msk.f32.mxu0 %vm1901_vm5, %v1902_v47 }
  0xea   :  { %v1524_v9 = vpop.f32.mrb[0].mxu0  ;;  %v2000_v10 = vpop.f32.mrb[0].mxu1 }
  0xeb   :  { %v2005_v12 = vmul.f32 %v1524_v9, %v43_v6  ;;  %v121_v13 = vpop.f32.mrb[1].mxu0  ;;  %v2007_v14 = vpop.f32.mrb[1].mxu1  ;;  %v355_v15 = vmul.f32 %v2000_v10, %v1420_v7  ;;  %v621_v25 = vmul.f32 %v2000_v10, %v1423_v23 }
  0xec   :  { %v2010_v16 = vmul.f32 %v121_v13, %v42_v8  ;;  %v354_v19 = vmul.f32 %v1420_v7, %v2007_v14  ;;  %v620_v26 = vmul.f32 %v1423_v23, %v2007_v14 }
  0xed   :  { %358 = vadd.xlane.f32.xlu1 %v355_v15  ;;  %v345_v17 = vmul.f32 %v1419_v11, %v2005_v12  ;;  %v611_v22 = vmul.f32 %v1422_v20, %v2005_v12 }
  0xee   :  { %v2015_v18 = vpack.c.bf16 %v2005_v12, %v2010_v16  ;;  %v344_v21 = vmul.f32 %v1419_v11, %v2010_v16  ;;  %v610_v24 = vmul.f32 %v1422_v20, %v2010_v16 }
  0xef   :  { %348 = vadd.xlane.f32.xlu0 %v345_v17 }
  0xf0   :  { %1709 = vmatpush3.bf16.msra.mxu1 %v2015_v18 }
  0xf1   :  { %356 = vadd.xlane.f32.xlu1 %v354_v19  ;;  %1734 = vmatprep.subr.bf16.mxu1 %v1900_v5 }
  0xf3   :  { %346 = vadd.xlane.f32.xlu0 %v344_v21 }
  0xf5   :  { %614 = vadd.xlane.f32.xlu1 %v611_v22 }
  0xf7   :  { %612 = vadd.xlane.f32.xlu0 %v610_v24 }
  0xf9   :  { %624 = vadd.xlane.f32.xlu1 %v621_v25 }
  0xfb   :  { %622 = vadd.xlane.f32.xlu0 %v620_v26 }
 0x17a   :  { %v359_v27 = vpop.xlane.xlu1 %358 }
 0x17c   :  { %v349_v28 = vpop.xlane.xlu0 %348 }
 0x17d   :  { %v361_v29 = vadd.f32 %v359_v27, %v349_v28 }
 0x17e   :  { %v357_v30 = vpop.xlane.xlu1 %356 }
 0x17f   :  { %vm363_vm1 = vcmp.ge.f32.partialorder %v361_v29, 0.0  ;;  %v365_v31 = vmul.f32 0.01, %v361_v29 }
 0x180   :  { %v347_v32 = vpop.xlane.xlu0 %346 }
 0x181   :  { %v367_v33 = vsel %vm363_vm1, %v361_v29, %v365_v31  ;;  %v360_v34 = vadd.f32 %v357_v30, %v347_v32 }
 0x182   :  { %v615_v35 = vpop.xlane.xlu1 %614  ;;  %v369_v36 = vsel %vm214_vm2, %v367_v33, -inf }
 0x183   :  { %vm362_vm4 = vcmp.ge.f32.partialorder %v360_v34, 0.0  ;;  %v364_v37 = vmul.f32 0.01, %v360_v34  ;;  %v371_v40 = vsel %vm48_vm0, %v369_v36, -inf }
 0x184   :  { %v613_v38 = vpop.xlane.xlu0 %612 }
 0x185   :  { %v366_v39 = vsel %vm362_vm4, %v360_v34, %v364_v37 }
 0x186   :  { %v368_v41 = vsel %vm213_vm3, %v366_v39, -inf  ;;  %v625_v42 = vpop.xlane.xlu1 %624 }
 0x187   :  { %v370_v43 = vsel %vm48_vm0, %v368_v41, -inf  ;;  %v627_v44 = vadd.f32 %v625_v42, %v615_v35 }
 0x188   :  { %v372_v45 = vmax.f32 %v370_v43, %v371_v40  ;;  %v623_v46 = vpop.xlane.xlu0 %622 }
 0x189   :  { %vm629_vm6 = vcmp.ge.f32.partialorder %v627_v44, 0.0  ;;  %v631_v48 = vmul.f32 0.01, %v627_v44  ;;  %v626_v49 = vadd.f32 %v623_v46, %v613_v38 }
 0x18a   :  { %v373_v50 = vrot.slane %v372_v45, 4 }
 0x18b   :  { %v633_v51 = vsel %vm629_vm6, %v627_v44, %v631_v48  ;;  %vm628_vm7 = vcmp.ge.f32.partialorder %v626_v49, 0.0  ;;  %v630_v52 = vmul.f32 0.01, %v626_v49 }
 0x18c   :  { %v374_v53 = vmax.f32 %v372_v45, %v373_v50  ;;  %v635_v54 = vsel %vm214_vm2, %v633_v51, -inf }
 0x18d   :  { %v632_v55 = vsel %vm628_vm7, %v626_v49, %v630_v52  ;;  %v637_v58 = vsel %vm48_vm0, %v635_v54, -inf }
 0x18e   :  { %v375_v56 = vrot.slane %v374_v53, 2  ;;  %v634_v57 = vsel %vm213_vm3, %v632_v55, -inf }
 0x18f   :  { %v636_v59 = vsel %vm48_vm0, %v634_v57, -inf }
 0x190   :  { %v376_v60 = vmax.f32 %v374_v53, %v375_v56  ;;  %v638_v61 = vmax.f32 %v636_v59, %v637_v58 }
 0x192   :  { %v377_v62 = vrot.slane %v376_v60, 1  ;;  %v639_v63 = vrot.slane %v638_v61, 4 }
 0x194   :  { %v378_v1 = vmax.f32 %v376_v60, %v377_v62  ;;  %v640_v3 = vmax.f32 %v638_v61, %v639_v63  ;;  %v1425_v60 = vld [vmem:[%s2209_s5 + $0x2] ss:$0 sm:$0xff] }
 0x195   :  { %v876_v61 = vmul.f32 %v1425_v60, %v2010_v16  ;;  %v1426_v62 = vld [vmem:[%s2210_s6 + $0x2] ss:$0 sm:$0xff]  ;;  %v877_v63 = vmul.f32 %v1425_v60, %v2005_v12 }
 0x196   :  { %vm379_vm8 = vweird.f32 %v378_v1  ;;  %v641_v6 = vrot.slane %v640_v3, 2 }
 0x197   :  { %vm380_vm10 = vmxor %vm379_vm8, %vm1903_vm9 }
 0x198   :  { %v381_v7 = vsel %vm380_vm10, %v378_v1, 0.0  ;;  %v642_v8 = vmax.f32 %v640_v3, %v641_v6  ;;  %v886_v1 = vmul.f32 %v1426_v62, %v2007_v14  ;;  %v1428_v3 = vld [vmem:[%s2209_s5 + $0x3] ss:$0 sm:$0xff]  ;;  %v887_v6 = vmul.f32 %v2000_v10, %v1426_v62 }
 0x199   :  { %v382_v9 = vsub.f32 %v368_v41, %v381_v7  ;;  %v383_v11 = vsub.f32 %v369_v36, %v381_v7  ;;  %v1142_v7 = vmul.f32 %v1428_v3, %v2010_v16 }
 0x19a   :  { %v643_v13 = vrot.slane %v642_v8, 1 }
 0x19b   :  { %v384_v15 = vmul.f32 1.442695, %v382_v9  ;;  %v386_v17 = vmul.f32 1.442695, %v383_v11  ;;  %v1143_v9 = vmul.f32 %v1428_v3, %v2005_v12 }
 0x19c   :  { %v644_v19 = vmax.f32 %v642_v8, %v643_v13  ;;  %v1429_v8 = vld [vmem:[%s2210_s6 + $0x3] ss:$0 sm:$0xff] }
 0x19d   :  { %1824 = vpow2.f32 %v384_v15  ;;  %v1152_v11 = vmul.f32 %v1429_v8, %v2007_v14  ;;  %v1153_v13 = vmul.f32 %v2000_v10, %v1429_v8  ;;  %v1904_v10 = vmov 1.0|1.0   ;;  %v590_v14 = vld [vmem:[#allocation2 + $0x80] sm:$0xff]  ;;  %v591_v15 = vld [vmem:[#allocation2 + $0x88] sm:$0xff] }
 0x19e   :  { %1826 = vpow2.f32 %v386_v17  ;;  %vm645_vm11 = vweird.f32 %v644_v19  ;;  %1706 = vmatpush3.bf16.msra.mxu0 %v1904_v10  ;;  %v1738_v17 = vpack.c.bf16 %v591_v15, %v590_v14  ;;  %v603_v8 = vld [vmem:[#allocation2 + $0xe8] sm:$0xff]  ;;  %v604_v10 = vld [vmem:[#allocation2 + $0xf0] sm:$0xff]  ;;  %v605_v14 = vld [vmem:[#allocation2 + $0xf8] sm:$0xff] }
 0x19f   :  { %vm646_vm12 = vmxor %vm645_vm11, %vm1903_vm9  ;;  %1710 = vmatprep.subr.bf16.mxu0 %v1900_v5  ;;  %v1759_v15 = vpack.c.bf16 %v605_v14, %v604_v10  ;;  %v336_v14 = vld [vmem:[#allocation2 + $0x60] sm:$0xff] }
 0x1a0   :  { %v647_v20 = vsel %vm646_vm12, %v644_v19, 0.0  ;;  %v592_v19 = vld [vmem:[#allocation2 + $0x90] sm:$0xff] }
 0x1a1   :  { %v648_v21 = vsub.f32 %v634_v57, %v647_v20  ;;  %v649_v22 = vsub.f32 %v635_v54, %v647_v20  ;;  %v593_v20 = vld [vmem:[#allocation2 + $0x98] sm:$0xff] }
 0x1a3   :  { %v650_v23 = vmul.f32 1.442695, %v648_v21  ;;  %v652_v24 = vmul.f32 1.442695, %v649_v22  ;;  %v1741_v21 = vpack.c.bf16 %v593_v20, %v592_v19  ;;  %v594_v22 = vld [vmem:[#allocation2 + $0xa0] sm:$0xff] }
 0x1a5   :  { %1828 = vpow2.f32 %v650_v23  ;;  %v595_v23 = vld [vmem:[#allocation2 + $0xa8] sm:$0xff] }
 0x1a6   :  { %1830 = vpow2.f32 %v652_v24  ;;  %v1744_v24 = vpack.c.bf16 %v595_v23, %v594_v22 }
 0x1a7   :  { %v1825_v25 = vpop.eup %1824 }
 0x1a8   :  { %v1827_v26 = vpop.eup %1826  ;;  %v388_v27 = vsel %vm213_vm3, %v1825_v25, 0.0  ;;  %v596_v25 = vld [vmem:[#allocation2 + $0xb0] sm:$0xff] }
 0x1a9   :  { %v389_v28 = vsel %vm214_vm2, %v1827_v26, 0.0  ;;  %v390_v29 = vsel %vm48_vm0, %v388_v27, 0.0  ;;  %v597_v26 = vld [vmem:[#allocation2 + $0xb8] sm:$0xff] }
 0x1aa   :  { %v391_v30 = vsel %vm48_vm0, %v389_v28, 0.0 }
 0x1ab   :  { %v392_v31 = vadd.f32 %v391_v30, %v390_v29  ;;  %v599_v29 = vld [vmem:[#allocation2 + $0xc8] sm:$0xff] }
 0x1ad   :  { %v393_v32 = vrot.slane %v392_v31, 4 }
 0x1af   :  { %v1829_v33 = vpop.eup %1828  ;;  %v394_v34 = vadd.f32 %v393_v32, %v392_v31  ;;  %v600_v31 = vld [vmem:[#allocation2 + $0xd0] sm:$0xff]  ;;  %v601_v32 = vld [vmem:[#allocation2 + $0xd8] sm:$0xff] }
 0x1b0   :  { %v1831_v35 = vpop.eup %1830  ;;  %v654_v36 = vsel %vm213_vm3, %v1829_v33, 0.0  ;;  %v1753_v33 = vpack.c.bf16 %v601_v32, %v600_v31  ;;  %v324_v32 = vld [vmem:[#allocation2] sm:$0xff] }
 0x1b1   :  { %v395_v37 = vrot.slane %v394_v34, 2  ;;  %v655_v38 = vsel %vm214_vm2, %v1831_v35, 0.0  ;;  %v656_v39 = vsel %vm48_vm0, %v654_v36, 0.0 }
 0x1b2   :  { %v657_v40 = vsel %vm48_vm0, %v655_v38, 0.0 }
 0x1b3   :  { %v396_v41 = vadd.f32 %v395_v37, %v394_v34  ;;  %v658_v42 = vadd.f32 %v657_v40, %v656_v39 }
 0x1b5   :  { %v397_v43 = vrot.slane %v396_v41, 1  ;;  %v659_v44 = vrot.slane %v658_v42, 4 }
 0x1b7   :  { %v398_v45 = vadd.f32 %v397_v43, %v396_v41  ;;  %v660_v46 = vadd.f32 %v659_v44, %v658_v42 }
 0x1b9   :  { %vm399_vm13 = vcmp.gt.f32.partialorder %v398_v45, 0.0  ;;  %v661_v48 = vrot.slane %v660_v46, 2 }
 0x1ba   :  { %v400_v49 = vsel %vm399_vm13, %v398_v45, 1.0 }
 0x1bb   :  { %1832 = vrcp.f32 %v400_v49  ;;  %v662_v50 = vadd.f32 %v661_v48, %v660_v46 }
 0x1bd   :  { %v663_v51 = vrot.slane %v662_v50, 1 }
 0x1bf   :  { %v664_v52 = vadd.f32 %v663_v51, %v662_v50 }
 0x1c1   :  { %vm665_vm14 = vcmp.gt.f32.partialorder %v664_v52, 0.0 }
 0x1c2   :  { %v666_v53 = vsel %vm665_vm14, %v664_v52, 1.0 }
 0x1c3   :  { %1834 = vrcp.f32 %v666_v53 }
 0x1c5   :  { %v1833_v54 = vpop.eup %1832 }
 0x1c6   :  { %v402_v55 = vmul.f32 %v1833_v54, %v388_v27  ;;  %v403_v56 = vmul.f32 %v1833_v54, %v389_v28  ;;  %v1747_v27 = vpack.c.bf16 %v597_v26, %v596_v25  ;;  %v598_v28 = vld [vmem:[#allocation2 + $0xc0] sm:$0xff] }
 0x1c7   :  { %v1750_v30 = vpack.c.bf16 %v599_v29, %v598_v28 }
 0x1c8   :  { %404 = vxpose.xlu0.b32.start [1/2] (short) (narrow) %v402_v55, 8 }
 0x1cc   :  { %405 = vxpose.xlu0.b32.end [2/2] (short) (narrow) %v403_v56, 8 }
 0x1cd   :  { %v1835_v57 = vpop.eup %1834 }
 0x1ce   :  { %v668_v58 = vmul.f32 %v1835_v57, %v654_v36  ;;  %v669_v59 = vmul.f32 %v1835_v57, %v655_v38 }
 0x1d0   :  { %670 = vxpose.xlu1.b32.start [1/2] (short) (narrow) %v668_v58, 8 }
 0x1d4   :  { %671 = vxpose.xlu1.b32.end [2/2] (short) (narrow) %v669_v59, 8 }
 0x1f9   :  { %878 = vadd.xlane.f32.xlu0 %v876_v61 }
 0x1fb   :  { %880 = vadd.xlane.f32.xlu1 %v877_v63 }
 0x1fd   :  { %888 = vadd.xlane.f32.xlu0 %v886_v1 }
 0x1ff   :  { %890 = vadd.xlane.f32.xlu1 %v887_v6 }
 0x201   :  { %1144 = vadd.xlane.f32.xlu0 %v1142_v7  ;;  %v602_v7 = vld [vmem:[#allocation2 + $0xe0] sm:$0xff] }
 0x203   :  { %1146 = vadd.xlane.f32.xlu1 %v1143_v9 }
 0x205   :  { %1154 = vadd.xlane.f32.xlu0 %v1152_v11 }
 0x207   :  { %1156 = vadd.xlane.f32.xlu1 %v1153_v13  ;;  %v1756_v13 = vpack.c.bf16 %v603_v8, %v602_v7 }
 0x232   :  { %215 = vxpose.xlu0.b32.start [1/2] (short) (narrow) %v1969_v2, 8 }
 0x236   :  { %216 = vxpose.xlu0.b32.end [2/2] (short) (narrow) %v1979_v4, 8 }
 0x248   :  { %v420_v16 = vpop.trf.xlu0 }
 0x249   :  { %1542 = vmatmul.mubr.msk.f32.vlgmr.msra.gmra.mrb[2].mxu1 %vm247_vm15, %v420_v16 }
 0x24a   :  { %1736 = vmatpush3.bf16.msra.mxu1 %v2015_v18  ;;  %1583 = vmatprep.mubr.msk.f32.mxu1 %vm1901_vm5, %v1902_v47 }
 0x24b   :  { %1737 = vmatprep.subr.bf16.mxu1 %v1900_v5 }
 0x250   :  { %v686_v12 = vpop.trf.xlu1 }
 0x251   :  { %1584 = vmatmul.mubr.msk.f32.vlgmr.msra.gmra.mrb[4].mxu1 %vm247_vm15, %v686_v12 }
 0x252   :  { %1618 = vmatprep.mubr.msk.f32.mxu1 %vm1901_vm5, %v1902_v47  ;;  %1739 = vmatpush3.bf16.msra.mxu1 %v1738_v17 }
 0x253   :  { %1740 = vmatprep.subr.bf16.mxu1 %v1900_v5 }
 0x256   :  { %1742 = vmatpush3.bf16.msra.mxu1 %v1741_v21 }
 0x257   :  { %1743 = vmatprep.subr.bf16.mxu1 %v1900_v5 }
 0x25a   :  { %1745 = vmatpush3.bf16.msra.mxu1 %v1744_v24 }
 0x25b   :  { %1746 = vmatprep.subr.bf16.mxu1 %v1900_v5 }
 0x25e   :  { %1748 = vmatpush3.bf16.msra.mxu1 %v1747_v27 }
 0x25f   :  { %1749 = vmatprep.subr.bf16.mxu1 %v1900_v5 }
 0x262   :  { %1751 = vmatpush3.bf16.msra.mxu1 %v1750_v30 }
 0x263   :  { %1752 = vmatprep.subr.bf16.mxu1 %v1900_v5 }
 0x266   :  { %1754 = vmatpush3.bf16.msra.mxu1 %v1753_v33  ;;  %v325_v33 = vld [vmem:[#allocation2 + $0x8] sm:$0xff] }
 0x267   :  { %1755 = vmatprep.subr.bf16.mxu1 %v1900_v5 }
 0x26a   :  { %1757 = vmatpush3.bf16.msra.mxu1 %v1756_v13  ;;  %v335_v13 = vld [vmem:[#allocation2 + $0x58] sm:$0xff] }
 0x26b   :  { %1758 = vmatprep.subr.bf16.mxu1 %v1900_v5 }
 0x26e   :  { %1760 = vmatpush3.bf16.msra.mxu1 %v1759_v15  ;;  %v337_v15 = vld [vmem:[#allocation2 + $0x68] sm:$0xff] }
 0x26f   :  { %1788 = vmatprep.subr.bf16.mxu1 %v1900_v5 }
 0x286   :  { %v879_v34 = vpop.xlane.xlu0 %878 }
 0x288   :  { %v881_v35 = vpop.xlane.xlu1 %880 }
 0x28a   :  { %v889_v36 = vpop.xlane.xlu0 %888 }
 0x28b   :  { %v892_v37 = vadd.f32 %v889_v36, %v879_v34  ;;  %v1711_v36 = vpack.c.bf16 %v325_v33, %v324_v32 }
 0x28c   :  { %v891_v38 = vpop.xlane.xlu1 %890 }
 0x28d   :  { %vm894_vm1 = vcmp.ge.f32.partialorder %v892_v37, 0.0  ;;  %v896_v39 = vmul.f32 0.01, %v892_v37  ;;  %v893_v40 = vadd.f32 %v891_v38, %v881_v35  ;;  %v327_v38 = vld [vmem:[#allocation2 + $0x18] sm:$0xff] }
 0x28e   :  { %v1145_v41 = vpop.xlane.xlu0 %1144 }
 0x28f   :  { %v898_v42 = vsel %vm894_vm1, %v892_v37, %v896_v39  ;;  %vm895_vm4 = vcmp.ge.f32.partialorder %v893_v40, 0.0  ;;  %v897_v43 = vmul.f32 0.01, %v893_v40  ;;  %v326_v37 = vld [vmem:[#allocation2 + $0x10] sm:$0xff] }
 0x290   :  { %v900_v44 = vsel %vm213_vm3, %v898_v42, -inf  ;;  %v1147_v45 = vpop.xlane.xlu1 %1146 }
 0x291   :  { %v899_v46 = vsel %vm895_vm4, %v893_v40, %v897_v43  ;;  %v902_v50 = vsel %vm48_vm0, %v900_v44, -inf  ;;  %v1714_v43 = vpack.c.bf16 %v327_v38, %v326_v37 }
 0x292   :  { %v901_v48 = vsel %vm214_vm2, %v899_v46, -inf  ;;  %v1155_v49 = vpop.xlane.xlu0 %1154  ;;  %v328_v46 = vld [vmem:[#allocation2 + $0x20] sm:$0xff] }
 0x293   :  { %v903_v51 = vsel %vm48_vm0, %v901_v48, -inf  ;;  %v1158_v52 = vadd.f32 %v1155_v49, %v1145_v41 }
 0x294   :  { %v904_v53 = vmax.f32 %v902_v50, %v903_v51  ;;  %v1157_v54 = vpop.xlane.xlu1 %1156 }
 0x295   :  { %vm1160_vm6 = vcmp.ge.f32.partialorder %v1158_v52, 0.0  ;;  %v1162_v55 = vmul.f32 0.01, %v1158_v52  ;;  %v1159_v56 = vadd.f32 %v1157_v54, %v1147_v45  ;;  %v331_v54 = vld [vmem:[#allocation2 + $0x38] sm:$0xff] }
 0x296   :  { %v905_v57 = vrot.slane %v904_v53, 4 }
 0x297   :  { %v1164_v58 = vsel %vm1160_vm6, %v1158_v52, %v1162_v55  ;;  %vm1161_vm7 = vcmp.ge.f32.partialorder %v1159_v56, 0.0  ;;  %v1163_v59 = vmul.f32 0.01, %v1159_v56 }
 0x298   :  { %v906_v60 = vmax.f32 %v904_v53, %v905_v57  ;;  %v1166_v61 = vsel %vm213_vm3, %v1164_v58, -inf  ;;  %v330_v53 = vld [vmem:[#allocation2 + $0x30] sm:$0xff] }
 0x299   :  { %v1165_v62 = vsel %vm1161_vm7, %v1159_v56, %v1163_v59  ;;  %v1168_v3 = vsel %vm48_vm0, %v1166_v61, -inf  ;;  %v1720_v59 = vpack.c.bf16 %v331_v54, %v330_v53  ;;  %v861_v53 = vld [vmem:[#allocation2 + $0x128] sm:$0xff]  ;;  %v1126_v54 = vld [vmem:[#allocation2 + $0x1a0] sm:$0xff] }
 0x29a   :  { %v907_v63 = vrot.slane %v906_v60, 2  ;;  %v1167_v1 = vsel %vm214_vm2, %v1165_v62, -inf }
 0x29b   :  { %v1169_v6 = vsel %vm48_vm0, %v1167_v1, -inf }
 0x29c   :  { %v908_v9 = vmax.f32 %v906_v60, %v907_v63  ;;  %v1170_v11 = vmax.f32 %v1168_v3, %v1169_v6  ;;  %v332_v63 = vld [vmem:[#allocation2 + $0x40] sm:$0xff] }
 0x29e   :  { %v909_v16 = vrot.slane %v908_v9, 1  ;;  %v1171_v12 = vrot.slane %v1170_v11, 4 }
 0x2a0   :  { %v910_v17 = vmax.f32 %v908_v9, %v909_v16  ;;  %v1172_v19 = vmax.f32 %v1170_v11, %v1171_v12  ;;  %v334_v11 = vld [vmem:[#allocation2 + $0x50] sm:$0xff] }
 0x2a1   :  { %v1726_v12 = vpack.c.bf16 %v335_v13, %v334_v11  ;;  %v1132_v13 = vld [vmem:[#allocation2 + $0x1d0] sm:$0xff] }
 0x2a2   :  { %vm911_vm8 = vweird.f32 %v910_v17  ;;  %v1173_v20 = vrot.slane %v1172_v19, 2 }
 0x2a3   :  { %vm912_vm10 = vmxor %vm911_vm8, %vm1903_vm9 }
 0x2a4   :  { %v913_v21 = vsel %vm912_vm10, %v910_v17, 0.0  ;;  %v1174_v22 = vmax.f32 %v1172_v19, %v1173_v20  ;;  %v1729_v20 = vpack.c.bf16 %v337_v15, %v336_v14 }
 0x2a5   :  { %v914_v23 = vsub.f32 %v900_v44, %v913_v21  ;;  %v915_v24 = vsub.f32 %v901_v48, %v913_v21  ;;  %v329_v48 = vld [vmem:[#allocation2 + $0x28] sm:$0xff] }
 0x2a6   :  { %v1175_v25 = vrot.slane %v1174_v22, 1  ;;  %v1717_v51 = vpack.c.bf16 %v329_v48, %v328_v46 }
 0x2a7   :  { %v916_v26 = vmul.f32 1.442695, %v914_v23  ;;  %v918_v27 = vmul.f32 1.442695, %v915_v24  ;;  %v339_v23 = vld [vmem:[#allocation2 + $0x78] sm:$0xff] }
 0x2a8   :  { %v1176_v28 = vmax.f32 %v1174_v22, %v1175_v25  ;;  %v338_v22 = vld [vmem:[#allocation2 + $0x70] sm:$0xff] }
 0x2a9   :  { %1836 = vpow2.f32 %v916_v26  ;;  %v1732_v25 = vpack.c.bf16 %v339_v23, %v338_v22  ;;  %v1135_v22 = vld [vmem:[#allocation2 + $0x1e8] sm:$0xff] }
 0x2aa   :  { %1838 = vpow2.f32 %v918_v27  ;;  %vm1177_vm11 = vweird.f32 %v1176_v28 }
 0x2ab   :  { %vm1178_vm12 = vmxor %vm1177_vm11, %vm1903_vm9 }
 0x2ac   :  { %v1179_v29 = vsel %vm1178_vm12, %v1176_v28, 0.0 }
 0x2ad   :  { %v1180_v30 = vsub.f32 %v1166_v61, %v1179_v29  ;;  %v1181_v31 = vsub.f32 %v1167_v1, %v1179_v29  ;;  %v333_v1 = vld [vmem:[#allocation2 + $0x48] sm:$0xff] }
 0x2ae   :  { %v1723_v8 = vpack.c.bf16 %v333_v1, %v332_v63  ;;  %v864_v63 = vld [vmem:[#allocation2 + $0x140] sm:$0xff]  ;;  %v865_v1 = vld [vmem:[#allocation2 + $0x148] sm:$0xff] }
 0x2af   :  { %v1182_v34 = vmul.f32 1.442695, %v1180_v30  ;;  %v1184_v35 = vmul.f32 1.442695, %v1181_v31 }
 0x2b1   :  { %1840 = vpow2.f32 %v1182_v34 }
 0x2b2   :  { %1842 = vpow2.f32 %v1184_v35  ;;  %v231_v39 = vpop.trf.xlu0 }
 0x2b3   :  { %v1837_v40 = vpop.eup %1836  ;;  %1535 = vmatmul.mubr.msk.f32.vlgmr.msra.gmra.mrb[2].mxu0 %vm247_vm15, %v231_v39  ;;  %v856_v39 = vld [vmem:[#allocation2 + $0x100] sm:$0xff] }
 0x2b4   :  { %v1839_v41 = vpop.eup %1838  ;;  %v2119_v42 = vsel %vm213_vm3, %v1837_v40, 0.0  ;;  %1712 = vmatpush3.bf16.msra.mxu0 %v1711_v36  ;;  %1576 = vmatprep.mubr.msk.f32.mxu0 %vm1901_vm5, %v1902_v47  ;;  %v857_v40 = vld [vmem:[#allocation2 + $0x108] sm:$0xff] }
 0x2b5   :  { %v2125_v44 = vsel %vm214_vm2, %v1839_v41, 0.0  ;;  %v922_v45 = vsel %vm48_vm0, %v2119_v42, 0.0  ;;  %1713 = vmatprep.subr.bf16.mxu0 %v1900_v5  ;;  %v1765_v41 = vpack.c.bf16 %v857_v40, %v856_v39 }
 0x2b6   :  { %v923_v49 = vsel %vm48_vm0, %v2125_v44, 0.0 }
 0x2b7   :  { %v924_v50 = vadd.f32 %v923_v49, %v922_v45  ;;  %v1123_v45 = vld [vmem:[#allocation2 + $0x188] sm:$0xff] }
 0x2b8   :  { %1715 = vmatpush3.bf16.msra.mxu0 %v1714_v43 }
 0x2b9   :  { %v925_v52 = vrot.slane %v924_v50, 4  ;;  %1716 = vmatprep.subr.bf16.mxu0 %v1900_v5 }
 0x2bb   :  { %v1841_v55 = vpop.eup %1840  ;;  %v926_v56 = vadd.f32 %v925_v52, %v924_v50  ;;  %v1124_v50 = vld [vmem:[#allocation2 + $0x190] sm:$0xff]  ;;  %v860_v52 = vld [vmem:[#allocation2 + $0x120] sm:$0xff] }
 0x2bc   :  { %v1843_v57 = vpop.eup %1842  ;;  %v1186_v58 = vsel %vm213_vm3, %v1841_v55, 0.0  ;;  %1718 = vmatpush3.bf16.msra.mxu0 %v1717_v51  ;;  %v1125_v51 = vld [vmem:[#allocation2 + $0x198] sm:$0xff]  ;;  %v1127_v55 = vld [vmem:[#allocation2 + $0x1a8] sm:$0xff] }
 0x2bd   :  { %v927_v60 = vrot.slane %v926_v56, 2  ;;  %v1187_v61 = vsel %vm214_vm2, %v1843_v57, 0.0  ;;  %v1188_v62 = vsel %vm48_vm0, %v1186_v58, 0.0  ;;  %1719 = vmatprep.subr.bf16.mxu0 %v1900_v5  ;;  %v862_v57 = vld [vmem:[#allocation2 + $0x130] sm:$0xff] }
 0x2be   :  { %v1189_v3 = vsel %vm48_vm0, %v1187_v61, 0.0 }
 0x2bf   :  { %v928_v6 = vadd.f32 %v927_v60, %v926_v56  ;;  %v1190_v7 = vadd.f32 %v1189_v3, %v1188_v62  ;;  %v1771_v56 = vpack.c.bf16 %v861_v53, %v860_v52  ;;  %v1128_v60 = vld [vmem:[#allocation2 + $0x1b0] sm:$0xff] }
 0x2c0   :  { %1721 = vmatpush3.bf16.msra.mxu0 %v1720_v59  ;;  %v1798_v59 = vpack.c.bf16 %v1127_v55, %v1126_v54 }
 0x2c1   :  { %v929_v2 = vrot.slane %v928_v6, 1  ;;  %v1191_v9 = vrot.slane %v1190_v7, 4  ;;  %1722 = vmatprep.subr.bf16.mxu0 %v1900_v5 }
 0x2c3   :  { %v930_v4 = vadd.f32 %v929_v2, %v928_v6  ;;  %v1192_v16 = vadd.f32 %v1191_v9, %v1190_v7  ;;  %v1130_v6 = vld [vmem:[#allocation2 + $0x1c0] sm:$0xff]  ;;  %v1131_v7 = vld [vmem:[#allocation2 + $0x1c8] sm:$0xff]  ;;  %v866_v2 = vld [vmem:[#allocation2 + $0x150] sm:$0xff] }
 0x2c4   :  { %1724 = vmatpush3.bf16.msra.mxu0 %v1723_v8  ;;  %v1777_v8 = vpack.c.bf16 %v865_v1, %v864_v63  ;;  %v867_v9 = vld [vmem:[#allocation2 + $0x158] sm:$0xff]  ;;  %v1804_v11 = vpack.c.bf16 %v1131_v7, %v1130_v6 }
 0x2c5   :  { %vm931_vm2 = vcmp.gt.f32.partialorder %v930_v4, 0.0  ;;  %v1193_v10 = vrot.slane %v1192_v16, 2  ;;  %1725 = vmatprep.subr.bf16.mxu0 %v1900_v5 }
 0x2c6   :  { %v932_v17 = vsel %vm931_vm2, %v930_v4, 1.0  ;;  %v1133_v4 = vld [vmem:[#allocation2 + $0x1d8] sm:$0xff] }
 0x2c7   :  { %1844 = vrcp.f32 %v932_v17  ;;  %v1194_v19 = vadd.f32 %v1193_v10, %v1192_v16  ;;  %v1780_v16 = vpack.c.bf16 %v867_v9, %v866_v2  ;;  %v869_v10 = vld [vmem:[#allocation2 + $0x168] sm:$0xff]  ;;  %v1807_v14 = vpack.c.bf16 %v1133_v4, %v1132_v13  ;;  %v870_v17 = vld [vmem:[#allocation2 + $0x170] sm:$0xff] }
 0x2c8   :  { %1727 = vmatpush3.bf16.msra.mxu0 %v1726_v12  ;;  %v868_v12 = vld [vmem:[#allocation2 + $0x160] sm:$0xff] }
 0x2c9   :  { %v1195_v21 = vrot.slane %v1194_v19, 1  ;;  %1728 = vmatprep.subr.bf16.mxu0 %v1900_v5  ;;  %v1783_v15 = vpack.c.bf16 %v869_v10, %v868_v12 }
 0x2cb   :  { %v1196_v24 = vadd.f32 %v1195_v21, %v1194_v19  ;;  %v871_v19 = vld [vmem:[#allocation2 + $0x178] sm:$0xff]  ;;  %v1134_v21 = vld [vmem:[#allocation2 + $0x1e0] sm:$0xff] }
 0x2cc   :  { %1730 = vmatpush3.bf16.msra.mxu0 %v1729_v20  ;;  %v1786_v20 = vpack.c.bf16 %v871_v19, %v870_v17  ;;  %v1810_v23 = vpack.c.bf16 %v1135_v22, %v1134_v21 }
 0x2cd   :  { %vm1197_vm0 = vcmp.gt.f32.partialorder %v1196_v24, 0.0  ;;  %1731 = vmatprep.subr.bf16.mxu0 %v1900_v5 }
 0x2ce   :  { %v1198_v26 = vsel %vm1197_vm0, %v1196_v24, 1.0  ;;  %v1136_v24 = vld [vmem:[#allocation2 + $0x1f0] sm:$0xff] }
 0x2cf   :  { %1846 = vrcp.f32 %v1198_v26 }
 0x2d0   :  { %1733 = vmatpush3.bf16.msra.mxu0 %v1732_v25  ;;  %v1137_v25 = vld [vmem:[#allocation2 + $0x1f8] sm:$0xff] }
 0x2d1   :  { %v1845_v27 = vpop.eup %1844  ;;  %1761 = vmatprep.subr.bf16.mxu0 %v1900_v5  ;;  %v1813_v26 = vpack.c.bf16 %v1137_v25, %v1136_v24 }
 0x2d2   :  { %v934_v28 = vmul.f32 %v1845_v27, %v2119_v42  ;;  %v935_v29 = vmul.f32 %v1845_v27, %v2125_v44  ;;  %v859_v42 = vld [vmem:[#allocation2 + $0x118] sm:$0xff]  ;;  %v1122_v44 = vld [vmem:[#allocation2 + $0x180] sm:$0xff] }
 0x2d3   :  { %v1792_v49 = vpack.c.bf16 %v1123_v45, %v1122_v44 }
 0x2d4   :  { %936 = vxpose.xlu1.b32.start [1/2] (short) (narrow) %v934_v28, 8 }
 0x2d8   :  { %937 = vxpose.xlu1.b32.end [2/2] (short) (narrow) %v935_v29, 8 }
 0x2d9   :  { %v1847_v30 = vpop.eup %1846 }
 0x2da   :  { %v1200_v31 = vmul.f32 %v1847_v30, %v1186_v58  ;;  %v1201_v32 = vmul.f32 %v1847_v30, %v1187_v61  ;;  %v863_v58 = vld [vmem:[#allocation2 + $0x138] sm:$0xff] }
 0x2db   :  { %v1129_v61 = vld [vmem:[#allocation2 + $0x1b8] sm:$0xff]  ;;  %v1774_v62 = vpack.c.bf16 %v863_v58, %v862_v57  ;;  %v1848_v57 = vld [vmem:[%s2204_s0] sm:$0xff]  ;;  %s1905_s0 = smov [#allocation5]  }
 0x2dc   :  { %1202 = vxpose.xlu0.b32.start [1/2] (short) (narrow) %v1200_v31, 8  ;;  %v1801_v3 = vpack.c.bf16 %v1129_v61, %v1128_v60  ;;  %v1390_v2 = vrot.slane %v1848_v57, 4  ;;  %s1405_s18 = sshll.u32 %s1905_s0, 4  ;;  %s1406_s18 = int_to_ptr.vmem [resolvable:$true] %s1405_s18 }
 0x2dd   :  { %s1871_s19 = scalar_lea.vmem %s1406_s18, 16  ;;  %s1875_s20 = scalar_lea.vmem %s1406_s18, 32 }
 0x2de   :  { %v1391_v9 = vadd.f32 %v1848_v57, %v1390_v2  ;;  %p1872_p8 = scmp.ne.s32.totalorder %s1406_s18, %s1871_s19  ;;  %p1876_p9 = scmp.lt.s32.totalorder %s1406_s18, %s1406_s18 }
 0x2df   :  { %p1877_p10 = scmp.lt.s32.totalorder %s1875_s20, %s1871_s19 }
 0x2e0   :  { %1203 = vxpose.xlu0.b32.end [2/2] (short) (narrow) %v1201_v32, 8 }
 0x2e1   :  { %p1878_p11 = por %p1877_p10, %p1876_p9 }
 0x2e3   :  { %p1879_p12 = pnand %p1878_p11, %p1872_p8 }
 0x31c   :  { %v505_v33 = vpop.f32.mrb[2].mxu1 }
 0x31d   :  { %1577 = vmatmul.mubr.f32.vlgmr.msra.gmra.mrb[4].mxu0 %v505_v33  ;;  %v1543_v34 = vpop.f32.mrb[3].mxu1 }
 0x31e   :  { %1763 = vmatpush3.bf16.msra.mxu0 %v2015_v18  ;;  %1625 = vmatprep.mubr.msk.f32.mxu0 %vm1901_vm5, %v1902_v47 }
 0x31f   :  { %1764 = vmatprep.subr.bf16.mxu0 %v1900_v5 }
 0x324   :  { %v771_v35 = vpop.f32.mrb[4].mxu1 }
 0x325   :  { %1619 = vmatmul.mubr.f32.vlgmr.msra.gmra.mrb[6].mxu1 %v771_v35  ;;  %v1585_v36 = vpop.f32.mrb[5].mxu1 }
 0x326   :  { %1790 = vmatpush3.bf16.msra.mxu1 %v2015_v18  ;;  %1667 = vmatprep.mubr.msk.f32.mxu1 %vm1901_vm5, %v1902_v47  ;;  %v858_v18 = vld [vmem:[#allocation2 + $0x110] sm:$0xff] }
 0x327   :  { %1791 = vmatprep.subr.bf16.mxu1 %v1900_v5  ;;  %v1768_v48 = vpack.c.bf16 %v859_v42, %v858_v18 }
 0x354   :  { %v952_v37 = vpop.trf.xlu1 }
 0x355   :  { %1626 = vmatmul.mubr.msk.f32.vlgmr.msra.gmra.mrb[6].mxu0 %vm247_vm15, %v952_v37 }
 0x356   :  { %1660 = vmatprep.mubr.msk.f32.mxu0 %vm1901_vm5, %v1902_v47  ;;  %1766 = vmatpush3.bf16.msra.mxu0 %v1765_v41 }
 0x357   :  { %1767 = vmatprep.subr.bf16.mxu0 %v1900_v5 }
 0x35a   :  { %1769 = vmatpush3.bf16.msra.mxu0 %v1768_v48 }
 0x35b   :  { %1770 = vmatprep.subr.bf16.mxu0 %v1900_v5 }
 0x35c   :  { %v1218_v38 = vpop.trf.xlu0 }
 0x35d   :  { %1668 = vmatmul.mubr.msk.f32.vlgmr.msra.gmra.mrb[8].mxu1 %vm247_vm15, %v1218_v38 }
 0x35e   :  { %1702 = vmatprep.mubr.msk.f32.mxu1 %vm1901_vm5, %v1902_v47  ;;  %1793 = vmatpush3.bf16.msra.mxu1 %v1792_v49  ;;  %v1795_v47 = vpack.c.bf16 %v1125_v51, %v1124_v50 }
 0x35f   :  { %1794 = vmatprep.subr.bf16.mxu1 %v1900_v5  ;;  %1772 = vmatpush3.bf16.msra.mxu0 %v1771_v56 }
 0x360   :  { %1773 = vmatprep.subr.bf16.mxu0 %v1900_v5 }
 0x362   :  { %1796 = vmatpush3.bf16.msra.mxu1 %v1795_v47 }
 0x363   :  { %1797 = vmatprep.subr.bf16.mxu1 %v1900_v5  ;;  %1775 = vmatpush3.bf16.msra.mxu0 %v1774_v62 }
 0x364   :  { %1776 = vmatprep.subr.bf16.mxu0 %v1900_v5 }
 0x366   :  { %1799 = vmatpush3.bf16.msra.mxu1 %v1798_v59 }
 0x367   :  { %1800 = vmatprep.subr.bf16.mxu1 %v1900_v5  ;;  %1778 = vmatpush3.bf16.msra.mxu0 %v1777_v8 }
 0x368   :  { %1779 = vmatprep.subr.bf16.mxu0 %v1900_v5 }
 0x36a   :  { %1802 = vmatpush3.bf16.msra.mxu1 %v1801_v3 }
 0x36b   :  { %1803 = vmatprep.subr.bf16.mxu1 %v1900_v5  ;;  %1781 = vmatpush3.bf16.msra.mxu0 %v1780_v16 }
 0x36c   :  { %1782 = vmatprep.subr.bf16.mxu0 %v1900_v5 }
 0x36e   :  { %1805 = vmatpush3.bf16.msra.mxu1 %v1804_v11  ;;  %v1392_v11 = vrot.slane %v1391_v9, 2 }
 0x36f   :  { %1806 = vmatprep.subr.bf16.mxu1 %v1900_v5  ;;  %1784 = vmatpush3.bf16.msra.mxu0 %v1783_v15 }
 0x370   :  { %1785 = vmatprep.subr.bf16.mxu0 %v1900_v5  ;;  %v1393_v13 = vadd.f32 %v1392_v11, %v1391_v9 }
 0x372   :  { %1808 = vmatpush3.bf16.msra.mxu1 %v1807_v14  ;;  %v1394_v4 = vrot.slane %v1393_v13, 1 }
 0x373   :  { %1809 = vmatprep.subr.bf16.mxu1 %v1900_v5  ;;  %1787 = vmatpush3.bf16.msra.mxu0 %v1786_v20 }
 0x374   :  { %v1395_v12 = vadd.f32 %v1394_v4, %v1393_v13 }
 0x376   :  { %1811 = vmatpush3.bf16.msra.mxu1 %v1810_v23 }
 0x377   :  { %1812 = vmatprep.subr.bf16.mxu1 %v1900_v5 }
 0x37a   :  { %1814 = vmatpush3.bf16.msra.mxu1 %v1813_v26 }
 0x386   :  { %v2161_v43 = vpop.f32.mrb[2].mxu0 }
 0x387   :  { %v1536_v46 = vpop.f32.mrb[3].mxu0  ;;  %vm321_vm3 = vcmp.gt.f32.partialorder %v2161_v43, 0.0 }
 0x3f0   :  { %v575_v27 = vpop.f32.mrb[4].mxu0 }
 0x3f1   :  { %v579_v28 = vsel %vm321_vm3, %v575_v27, %v1961_v0  ;;  %v1578_v29 = vpop.f32.mrb[5].mxu0 }
 0x3f2   :  { %v580_v30 = vrot.slane %v579_v28, 4 }
 0x3f4   :  { %v581_v31 = vadd.f32 %v580_v30, %v579_v28 }
 0x3f6   :  { %v582_v32 = vrot.slane %v581_v31, 2 }
 0x3f8   :  { %v841_v33 = vpop.f32.mrb[6].mxu1  ;;  %v583_v36 = vadd.f32 %v582_v32, %v581_v31 }
 0x3f9   :  { %v845_v34 = vsel %vm321_vm3, %v841_v33, %v1961_v0  ;;  %v1620_v35 = vpop.f32.mrb[7].mxu1 }
 0x3fa   :  { %v846_v5 = vrot.slane %v845_v34, 4  ;;  %v584_v38 = vrot.slane %v583_v36, 1 }
 0x3fc   :  { %v847_v37 = vadd.f32 %v846_v5, %v845_v34  ;;  %v585_v18 = vadd.f32 %v584_v38, %v583_v36 }
 0x3fe   :  { %v848_v39 = vrot.slane %v847_v37, 2 }
 0x400   :  { %v849_v40 = vadd.f32 %v848_v39, %v847_v37 }
 0x402   :  { %v850_v41 = vrot.slane %v849_v40, 1 }
 0x404   :  { %v851_v42 = vadd.f32 %v850_v41, %v849_v40 }
 0x406   :  { %v852_v44 = vadd.f32 %v851_v42, %v585_v18 }
 0x428   :  { %v1037_v45 = vpop.f32.mrb[6].mxu0 }
 0x429   :  { %1661 = vmatmul.mubr.f32.vlgmr.msra.gmra.mrb[8].mxu0 %v1037_v45  ;;  %v1627_v46 = vpop.f32.mrb[7].mxu0 }
 0x430   :  { %v1303_v48 = vpop.f32.mrb[8].mxu1 }
 0x431   :  { %v1669_v49 = vpop.f32.mrb[9].mxu1  ;;  %1703 = vmatmul.mubr.f32.vlgmr.msra.gmra.mrb[10].mxu1 %v1303_v48 }
 0x4fc   :  { %v1107_v50 = vpop.f32.mrb[8].mxu0 }
 0x4fd   :  { %v1111_v51 = vsel %vm321_vm3, %v1107_v50, %v1961_v0  ;;  %v1662_v52 = vpop.f32.mrb[9].mxu0 }
 0x4fe   :  { %v1112_v53 = vrot.slane %v1111_v51, 4 }
 0x500   :  { %v1113_v47 = vadd.f32 %v1112_v53, %v1111_v51 }
 0x502   :  { %v1114_v54 = vrot.slane %v1113_v47, 2 }
 0x504   :  { %v1115_v55 = vadd.f32 %v1114_v54, %v1113_v47  ;;  %v1373_v56 = vpop.f32.mrb[10].mxu1 }
 0x505   :  { %v1377_v58 = vsel %vm321_vm3, %v1373_v56, %v1848_v57  ;;  %v1704_v59 = vpop.f32.mrb[11].mxu1 }
 0x506   :  { %v1116_v60 = vrot.slane %v1115_v55, 1  ;;  %v1378_v61 = vrot.slane %v1377_v58, 4 }
 0x508   :  { %v1379_v62 = vadd.f32 %v1378_v61, %v1377_v58  ;;  %v1117_v63 = vadd.f32 %v1116_v60, %v1115_v55 }
 0x50a   :  { %v1380_v1 = vrot.slane %v1379_v62, 2  ;;  %v1118_v0 = vadd.f32 %v1117_v63, %v852_v44 }
 0x50c   :  { %v1381_v3 = vadd.f32 %v1380_v1, %v1379_v62 }
 0x50e   :  { %v1382_v6 = vrot.slane %v1381_v3, 1 }
 0x510   :  { %v1383_v7 = vadd.f32 %v1382_v6, %v1381_v3 }
 0x512   :  { %v1384_v8 = vadd.f32 %v1383_v7, %v1118_v0 }
 0x514   :  { %1385 = vadd.xlane.f32.xlu1 %v1384_v8 }
 0x5a1   :  { %v1386_v16 = vpop.xlane.xlu1 %1385 }
 0x5a2   :  { %v1388_v43 = vmul.f32 0.00024414063, %v1386_v16 }
 0x5a4   :  { %v1389_v10 = vmax.f32 %v1388_v43, 0.0 }
 0x5a6   :  { %v1396_v14 = vmul.f32 8.0, %v1389_v10 }
 0x5a8   :  { %v1397_v15 = vadd.f32 %v1396_v14, %v1395_v12 }
 0x5aa   :  { %1398 = vst [vmem:[#allocation5] sm:$0x1] %v1397_v15 }
 0x5ab   :  { %1882 = shalt.err (!%p1879_p12)
}
 0x5ac   :  { %s1883_s22 = scalar_lea.hbm %s2211_s7, 16 }
 0x5ad   :  { %p1884_p13 = scmp.ne.s32.totalorder %s2211_s7, %s1883_s22  ;;  %p1887_p0 = scmp.lt.u32.totalorder %s1883_s22, %s2211_s7 }
 0x5af   :  { %p1889_p1 = pnand %p1887_p0, %p1884_p13 }
 0x5b1   :  { %1892 = shalt.err (!%p1889_p1)
}
 0x5b2   :  { %1408 = dma.vmem_to_hbm [thread:$0]  %s1406_s18, 16, %s2211_s7, [#allocation4]  }
 0x5b3   :  { %1895 = dma.done.wait [#allocation4], 16  }
 0x5b4   :  { %1896 = vsyncadd [#allocation4], 4294967280 }
 0x5b5   :  { %1412 = vsyncpa [#allocation3], 1 }
 0x5b6   :  { %1413 = vsyncpa [#allocation4], 1 }

</bundles_post_ra>
